<compile_context>
chip_gen: v6e
topology: v6e:2x2x1
jax: 0.10.0
libtpu: 0.0.40
codegen_flags: <defaults>
</compile_context>

<pallas_src>
import functools

import jax
import jax.numpy as jnp
from jax.experimental import pallas as pl
from jax.experimental.pallas import tpu as pltpu


_ALIGN = 128       # lane width / minimum padding granularity
_PREF_TILE = 256   # preferred tile on large axes (fills the 256-wide MXU on v6e/v7x)


def _pad_to(n, m):
    return ((n + m - 1) // m) * m


def _pad_dim(n):
    """Pad a logical dim to a tile-friendly size: 256-multiple if large, else 128-multiple."""
    return _pad_to(n, _PREF_TILE if n >= _PREF_TILE else _ALIGN)


def _tile_for(dim, pref=_PREF_TILE):
    """Largest tile <= pref (multiple of 128) that divides `dim` (dim is a 128-multiple)."""
    t = min(pref, dim)
    while dim % t:
        t -= _ALIGN
    return t


def _pad2d(x, rows, cols):
    r, c = x.shape
    return jnp.pad(x, ((0, rows - r), (0, cols - c)))


def _vmem_limit_bytes():
    # generation-aware scoped-VMEM ceiling: ~48 MiB on v7x (64 MiB), ~96 MiB on v5e/v6e (128 MiB)
    try:
        cap = pltpu.get_tpu_info().vmem_capacity_bytes
    except Exception:
        cap = 128 * 1024 * 1024
    return int(min(cap * 3 // 4, 100 * 1024 * 1024))


# ---------------------------------------------------------------------------
# Kernel 1: tiled dense linear  Y = X @ W (+ b) (+ ReLU)
#   used for the merged per-src-ntype projections and for ntypes with no
#   incoming relations (pure self-loop). M and N are both tiled.
# ---------------------------------------------------------------------------

def _linear_kernel(x_ref, w_ref, b_ref, o_ref, *, use_relu):
    acc = jnp.dot(x_ref[...], w_ref[...], preferred_element_type=jnp.float32)
    acc = acc + b_ref[...]
    if use_relu:
        acc = jnp.maximum(acc, 0.0)
    o_ref[...] = acc.astype(o_ref.dtype)


def linear(x, w, b, *, out_dtype, use_relu=False):
    # x: [M, K] bf16, w: [K, N] bf16, b: [1, N] f32; M, K, N are 128-multiples.
    m, k = x.shape
    n = w.shape[1]
    tm, tn = _tile_for(m), _tile_for(n)
    # TODO(synk): for very large K (>~4k) add a K grid axis + f32 accumulator so the
    #             (K, tn) weight block stays inside v7x's 64 MiB VMEM.
    return pl.pallas_call(
        functools.partial(_linear_kernel, use_relu=use_relu),
        out_shape=jax.ShapeDtypeStruct((m, n), out_dtype),
        grid_spec=pltpu.PrefetchScalarGridSpec(
            num_scalar_prefetch=0,
            grid=(m // tm, n // tn),
            in_specs=[
                pl.BlockSpec((tm, k), lambda i, j: (i, 0)),
                pl.BlockSpec((k, tn), lambda i, j: (0, j)),
                pl.BlockSpec((1, tn), lambda i, j: (0, j)),
            ],
            out_specs=pl.BlockSpec((tm, tn), lambda i, j: (i, j)),
        ),
        compiler_params=pltpu.CompilerParams(
            dimension_semantics=("parallel", "parallel"),
            vmem_limit_bytes=_vmem_limit_bytes(),
        ),
    )(x, w, b)


# ---------------------------------------------------------------------------
# Kernel 2: fused relation aggregation + self-loop for one dst ntype
#   out = act( A_cat @ XW_cat + X_dst @ W_loop + b_loop )
#   grid = (row_tiles [parallel], k_tiles [arbitrary]); the f32 VMEM accumulator
#   is *initialized* with the self-loop term at k==0 and finalized (ReLU + store)
#   at the last K step -> no HBM round trip of partials or of the self term.
# ---------------------------------------------------------------------------

def _agg_selfloop_kernel(a_ref, xw_ref, xd_ref, wl_ref, b_ref, o_ref, acc_ref, *, use_relu):
    k = pl.program_id(1)

    @pl.when(k == 0)
    def _():
        acc_ref[...] = (jnp.dot(xd_ref[...], wl_ref[...],
                                preferred_element_type=jnp.float32) + b_ref[...])

    acc_ref[...] += jnp.dot(a_ref[...], xw_ref[...],
                            preferred_element_type=jnp.float32)

    @pl.when(k == pl.num_programs(1) - 1)
    def _():
        out = acc_ref[...]
        if use_relu:
            out = jnp.maximum(out, 0.0)
        o_ref[...] = out.astype(o_ref.dtype)


def fused_aggregate(a_cat, xw_cat, x_dst, w_loop, b_loop, *, use_relu):
    # a_cat : [M, K_tot] bf16   concat of row-normalized adjacencies along K
    # xw_cat: [K_tot, N] bf16   concat of per-relation projected src features along K
    # x_dst : [M, D]     bf16   destination-node features
    # w_loop: [D, N]     bf16,  b_loop: [1, N] f32
    m, ktot = a_cat.shape
    n = xw_cat.shape[1]
    d = x_dst.shape[1]
    tm, tk = _tile_for(m), _tile_for(ktot)
    # TODO(synk): for out_pad >= ~2048 add a 'parallel' N grid axis so acc is (tm, tn)
    #             and the VMEM budget stays honest on v7x's 64 MiB.
    # TODO(synk): block-sparse skipping of all-zero A tiles (scalar-prefetched tile mask
    #             + pl.when guard) is the next win for real sparse graphs.
    return pl.pallas_call(
        functools.partial(_agg_selfloop_kernel, use_relu=use_relu),
        out_shape=jax.ShapeDtypeStruct((m, n), jnp.float32),
        grid_spec=pltpu.PrefetchScalarGridSpec(
            num_scalar_prefetch=0,
            grid=(m // tm, ktot // tk),          # rows outermost, K (reduction) innermost
            in_specs=[
                pl.BlockSpec((tm, tk), lambda i, k: (i, k)),
                pl.BlockSpec((tk, n), lambda i, k: (k, 0)),
                pl.BlockSpec((tm, d), lambda i, k: (i, 0)),   # fetched once per row tile
                pl.BlockSpec((d, n), lambda i, k: (0, 0)),    # resident across the grid
                pl.BlockSpec((1, n), lambda i, k: (0, 0)),    # resident across the grid
            ],
            out_specs=pl.BlockSpec((tm, n), lambda i, k: (i, 0)),
            scratch_shapes=[pltpu.VMEM((tm, n), jnp.float32)],
        ),
        compiler_params=pltpu.CompilerParams(
            dimension_semantics=("parallel", "arbitrary"),
            vmem_limit_bytes=_vmem_limit_bytes(),
        ),
    )(a_cat, xw_cat, x_dst, w_loop, b_loop)


# ---------------------------------------------------------------------------
# Static preparation (hoisted out of the per-call path: adjacency padding/concat,
# weight packing, casts — all constant across forward calls for a fixed graph).
# ---------------------------------------------------------------------------

def prepare_layer(graph, n_nodes, params):
    """graph:   dict rel_name -> (src_ntype, dst_ntype, A_norm [N_dst, N_src] f32)
       n_nodes: dict ntype -> node count
       params:  {'weight': {rel: [in,out]}, 'loop_w': {ntype: [in,out]}, 'loop_b': {ntype: [out]}}"""
    any_w = next(iter(params["weight"].values()))
    in_size, out_size = any_w.shape
    in_pad, out_pad = _pad_dim(in_size), _pad_dim(out_size)
    n_pad = {nt: _pad_dim(n) for nt, n in n_nodes.items()}

    rels_by_src, rels_by_dst = {}, {}
    for rel, (src_t, dst_t, _a) in graph.items():
        rels_by_src.setdefault(src_t, []).append(rel)
        rels_by_dst.setdefault(dst_t, []).append(rel)

    # merged projection weights per src ntype: [in_pad, n_rel*out_pad] bf16
    w_proj = {
        src_t: jnp.concatenate(
            [_pad2d(params["weight"][r], in_pad, out_pad) for r in rels],
            axis=1).astype(jnp.bfloat16)
        for src_t, rels in rels_by_src.items()
    }

    # concatenated normalized adjacency per dst ntype (each relation padded only to its
    # OWN src ntype's tile multiple, not to k_max across relations)
    a_cat, k_layout = {}, {}
    for dst_t, rels in rels_by_dst.items():
        blocks, layout = [], []
        for r in rels:
            src_t = graph[r][0]
            blocks.append(_pad2d(graph[r][2], n_pad[dst_t], n_pad[src_t]))
            layout.append((r, src_t, n_pad[src_t]))
        a_cat[dst_t] = jnp.concatenate(blocks, axis=1).astype(jnp.bfloat16)
        k_layout[dst_t] = layout

    loop_w = {nt: _pad2d(params["loop_w"][nt], in_pad, out_pad).astype(jnp.bfloat16)
              for nt in n_nodes}
    loop_b = {nt: jnp.pad(params["loop_b"][nt],
                          (0, out_pad - out_size)).reshape(1, -1).astype(jnp.float32)
              for nt in n_nodes}

    return dict(in_size=in_size, out_size=out_size, in_pad=in_pad, out_pad=out_pad,
                n_pad=n_pad, rels_by_src=rels_by_src, rels_by_dst=rels_by_dst,
                w_proj=w_proj, a_cat=a_cat, k_layout=k_layout,
                loop_w=loop_w, loop_b=loop_b)


# ---------------------------------------------------------------------------
# RelGraphConvLayer forward
# ---------------------------------------------------------------------------

def rel_graph_conv_layer(prep, inputs, *, activation="relu"):
    use_relu = (activation == "relu")
    n_nodes = {nt: x.shape[0] for nt, x in inputs.items()}
    in_pad, out_pad = prep["in_pad"], prep["out_pad"]
    n_pad = prep["n_pad"]

    # pad + cast node features once (bf16 MXU inputs; f32 accumulation in-kernel)
    x_pad = {nt: _pad2d(inputs[nt], n_pad[nt], in_pad).astype(jnp.bfloat16)
             for nt in inputs}

    # merged per-src-ntype projection: XW_cat = X_src @ [W_r1 | W_r2 | ...]
    xw = {}
    for src_t, rels in prep["rels_by_src"].items():
        w_cat = prep["w_proj"][src_t]
        xw_cat = linear(x_pad[src_t], w_cat,
                        jnp.zeros((1, w_cat.shape[1]), jnp.float32),
                        out_dtype=jnp.bfloat16, use_relu=False)
        for idx, r in enumerate(rels):
            xw[r] = xw_cat[:, idx * out_pad:(idx + 1) * out_pad]

    out = {}
    for nt in inputs:
        rels = prep["rels_by_dst"].get(nt)
        if not rels:
            # no incoming relations: hs == 0, so just the self-loop Linear (+ activation)
            h = linear(x_pad[nt], prep["loop_w"][nt], prep["loop_b"][nt],
                       out_dtype=jnp.float32, use_relu=use_relu)
        else:
            # sum_r A_r @ XW_r  ==  concat_r(A_r, axis=1) @ concat_r(XW_r, axis=0)
            xw_cat = jnp.concatenate(
                [xw[r] for (r, _s, _k) in prep["k_layout"][nt]], axis=0)
            h = fused_aggregate(prep["a_cat"][nt], xw_cat, x_pad[nt],
                                prep["loop_w"][nt], prep["loop_b"][nt],
                                use_relu=use_relu)
        out[nt] = h[:n_nodes[nt], :prep["out_size"]]
        # dropout p=0.0 -> identity at inference
        # TODO(synk): training-mode dropout would need pltpu.prng_* inside the finalize step.
    return out


# ---------------------------------------------------------------------------
# Deterministic synthetic setup + correctness check
# ---------------------------------------------------------------------------

def make_norm_adj(key, n_dst, n_src, p=0.3):
    adj = (jax.random.uniform(key, (n_dst, n_src)) < p).astype(jnp.float32)
    # DGL GraphConv norm='right': divide aggregated messages by clamp(in_degree, 1)
    deg = jnp.clip(jnp.sum(adj, axis=1, keepdims=True), 1.0, None)
    return adj / deg


if __name__ == "__main__":
    key = jax.random.PRNGKey(0)

    in_size, out_size = 40, 24
    ntypes = {"user": 16, "item": 24, "tag": 8}   # "tag" has no incoming relations
    relations = {
        "follows":  ("user", "user"),
        "buys":     ("user", "item"),
        "rev_buys": ("item", "user"),
    }

    keys = jax.random.split(key, 24)
    ki = iter(keys)

    inputs = {nt: jax.random.normal(next(ki), (n, in_size), jnp.float32)
              for nt, n in ntypes.items()}

    graph = {}
    for rel, (src_t, dst_t) in relations.items():
        graph[rel] = (src_t, dst_t,
                      make_norm_adj(next(ki), ntypes[dst_t], ntypes[src_t]))

    params = {
        "weight": {rel: 0.1 * jax.random.normal(next(ki), (in_size, out_size), jnp.float32)
                   for rel in relations},
        "loop_w": {nt: 0.1 * jax.random.normal(next(ki), (in_size, out_size), jnp.float32)
                   for nt in ntypes},
        "loop_b": {nt: 0.01 * jax.random.normal(next(ki), (out_size,), jnp.float32)
                   for nt in ntypes},
    }

    prep = prepare_layer(graph, ntypes, params)          # static: done once per graph
    out = rel_graph_conv_layer(prep, inputs, activation="relu")
    for v in out.values():
        jax.block_until_ready(v)

    # pure-JAX f32 reference (kernel uses bf16 MXU inputs -> loose tolerance)
    for nt in out:
        ref = sum((graph[r][2] @ inputs[graph[r][0]]) @ params["weight"][r]
                  for r in graph if graph[r][1] == nt)
        ref = jnp.maximum(ref + inputs[nt] @ params["loop_w"][nt] + params["loop_b"][nt], 0.0)
        assert out[nt].shape == (ntypes[nt], out_size), f"bad shape for ntype {nt}"
        assert jnp.allclose(out[nt], ref, atol=5e-2, rtol=5e-2), f"mismatch for ntype {nt}"

    print("KERNEL_OK")
</pallas_src>

<mosaic_0001>
module attributes {stable_mosaic.version = 11 : i64} {
  func.func @_linear_kernel(%arg0: i32, %arg1: i32, %arg2: memref<128x128xbf16, #tpu.memory_space<vmem>>, %arg3: memref<128x256xbf16, #tpu.memory_space<vmem>>, %arg4: memref<1x256xf32, #tpu.memory_space<vmem>>, %arg5: memref<128x256xbf16, #tpu.memory_space<vmem>>) attributes {dimension_semantics = [#tpu.dimension_semantics<parallel>, #tpu.dimension_semantics<parallel>], iteration_bounds = array<i64: 1, 1>, scalar_prefetch = 0 : i64, scratch_operands = 0 : i64, tpu.core_type = #tpu.core_type<tc>, window_params = [{transform_indices = @transform_0, window_bounds = array<i64: 128, 128>}, {transform_indices = @transform_1, window_bounds = array<i64: 128, 256>}, {transform_indices = @transform_2, window_bounds = array<i64: 1, 256>}, {transform_indices = @transform_3, window_bounds = array<i64: 128, 256>}]} {
    %c0 = arith.constant 0 : index
    %c0_0 = arith.constant 0 : index
    %0 = vector.load %arg2[%c0, %c0_0] : memref<128x128xbf16, #tpu.memory_space<vmem>>, vector<128x128xbf16>
    %c0_1 = arith.constant 0 : index
    %c0_2 = arith.constant 0 : index
    %1 = vector.load %arg3[%c0_1, %c0_2] : memref<128x256xbf16, #tpu.memory_space<vmem>>, vector<128x256xbf16>
    %cst = arith.constant dense<0.000000e+00> : vector<128x256xf32>
    %2 = tpu.matmul %0, %1, %cst {dimension_numbers = #tpu.dot_dimension_numbers<[1], [0], [0], [1], [0, 0, 1, 1], [], []>} : vector<128x128xbf16>, vector<128x256xbf16>, vector<128x256xf32> -> vector<128x256xf32>
    %c0_3 = arith.constant 0 : index
    %c0_4 = arith.constant 0 : index
    %3 = vector.load %arg4[%c0_3, %c0_4] : memref<1x256xf32, #tpu.memory_space<vmem>>, vector<1x256xf32>
    %4 = vector.broadcast %3 : vector<1x256xf32> to vector<128x256xf32>
    %5 = arith.addf %2, %4 : vector<128x256xf32>
    %6 = arith.truncf %5 : vector<128x256xf32> to vector<128x256xbf16>
    %c0_5 = arith.constant 0 : index
    %c0_6 = arith.constant 0 : index
    %7 = vector.load %arg5[%c0_5, %c0_6] : memref<128x256xbf16, #tpu.memory_space<vmem>>, vector<128x256xbf16>
    tpu.vector_store %arg5[%c0_5, %c0_6], %6 {strides = array<i32>} : memref<128x256xbf16, #tpu.memory_space<vmem>>, vector<128x256xbf16>,
    return
  }
  func.func @transform_0(%arg0: i32, %arg1: i32) -> (i32, i32) {
    %c0_i32 = arith.constant 0 : i32
    %c0_i32_0 = arith.constant 0 : i32
    return %arg0, %c0_i32 : i32, i32
  }
  func.func @transform_1(%arg0: i32, %arg1: i32) -> (i32, i32) {
    %c0_i32 = arith.constant 0 : i32
    %c0_i32_0 = arith.constant 0 : i32
    return %c0_i32, %arg1 : i32, i32
  }
  func.func @transform_2(%arg0: i32, %arg1: i32) -> (i32, i32) {
    %c0_i32 = arith.constant 0 : i32
    %c0_i32_0 = arith.constant 0 : i32
    return %c0_i32, %arg1 : i32, i32
  }
  func.func @transform_3(%arg0: i32, %arg1: i32) -> (i32, i32) {
    %c0_i32 = arith.constant 0 : i32
    return %arg0, %arg1 : i32, i32
  }
}

</mosaic_0001>

<bundles_post_ra>
// kernel: tpu_custom_call.1
= control target key start
LH: loop header
LB: loop body
LE: loop exit
PB: predicated region body
PF: predicated region fallthrough
CT: control target
= control target key end

     0   :  { %8 = vsyncpa [#allocation3], 0  ;;  %s727_s0 = inlined_call_operand.hbm [shape: bf16[128,128], index: 0, kind: input, shape index: {}]   ;;  %s728_s1 = inlined_call_operand.hbm [shape: bf16[128,256], index: 1, kind: input, shape index: {}]   ;;  %s729_s2 = inlined_call_operand.vmem [shape: f32[1,256], index: 2, kind: input, shape index: {}]   ;;  %s730_s3 = inlined_call_operand.hbm [shape: bf16[128,256], index: 3, kind: output, shape index: {}]  }
   0x1   :  { %9 = vsyncpa [#allocation6], 0 }
   0x2   :  { %10 = vsyncpa [#allocation4], 0  ;;  %s637_s12 = smov [#allocation2]  }
   0x3   :  { %s16_s13 = sshll.u32 %s637_s12, 4  ;;  %s17_s13 = int_to_ptr.vmem [resolvable:$true] %s16_s13 }
   0x4   :  { %s579_s14 = scalar_lea.vmem %s17_s13, 1024  ;;  %p584_p1 = scmp.lt.s32.totalorder %s17_s13, %s17_s13 }
   0x5   :  { %p580_p0 = scmp.ne.s32.totalorder %s17_s13, %s579_s14  ;;  %p585_p2 = scmp.lt.s32.totalorder %s579_s14, %s579_s14 }
   0x7   :  { %p586_p3 = por %p585_p2, %p584_p1 }
   0x9   :  { %p587_p4 = pnand %p586_p3, %p580_p0 }
   0xb   :  { %590 = shalt.err (!%p587_p4)
}
   0xc   :  { %s638_s15 = smov 64   ;;  %s639_s16 = smov 4  }
   0xd   :  { %22 = dma.hbm_to_vmem [thread:$0]  %s727_s0, 1024, %s17_s13, [#allocation3], %s638_s15, %s638_s15, %s639_s16  }
   0xe   :  { %s640_s19 = smov [#allocation5]  }
   0xf   :  { %s28_s20 = sshll.u32 %s640_s19, 4  ;;  %s29_s20 = int_to_ptr.vmem [resolvable:$true] %s28_s20 }
  0x10   :  { %s599_s21 = scalar_lea.vmem %s29_s20, 2048  ;;  %p604_p6 = scmp.lt.s32.totalorder %s29_s20, %s29_s20 }
  0x11   :  { %p600_p5 = scmp.ne.s32.totalorder %s29_s20, %s599_s21  ;;  %p605_p7 = scmp.lt.s32.totalorder %s599_s21, %s599_s21 }
  0x13   :  { %p606_p8 = por %p605_p7, %p604_p6 }
  0x15   :  { %p607_p9 = pnand %p606_p8, %p600_p5 }
  0x17   :  { %610 = shalt.err (!%p607_p9)
}
  0x18   :  { %s641_s22 = smov 128   ;;  %s642_s23 = smov 8  }
  0x19   :  { %34 = dma.hbm_to_vmem [thread:$0]  %s728_s1, 2048, %s29_s20, [#allocation6], %s641_s22, %s641_s22, %s642_s23  }
  0x1a   :  { %631 = dma.done.wait [#allocation3], 1024  }
  0x1b   :  { %632 = vsyncadd [#allocation3], 4294966272 }
  0x1c   :  { %633 = dma.done.wait [#allocation6], 2048  }
  0x1d   :  { %634 = vsyncadd [#allocation6], 4294965248  ;;  %v643_v0 = vmov 0   ;;  %v539_v1 = vld [vmem:[#allocation5 + $0x74] ss:$8 sps:$4 sm:$0xff]   ;;  %v563_v17 = vld [vmem:[#allocation2] sm:$0xff]   ;;  %v78_v25 = vlaneseq }
  0x1e   :  { %248 = vmatprep.mubr.bf16.mxu0 %v643_v0  ;;  %288 = vmatprep.mubr.bf16.mxu1 %v643_v0  ;;  %v541_v2 = vld [vmem:[#allocation5 + $0x70] ss:$8 sps:$4 sm:$0xff]   ;;  %v542_v3 = vld [vmem:[#allocation5 + $0x64] ss:$8 sps:$4 sm:$0xff]   ;;  %v544_v4 = vld [vmem:[#allocation5 + $0x60] ss:$8 sps:$4 sm:$0xff]  }
  0x1f   :  { %216 = vmatprep.subr.bf16.mxu0 %v539_v1  ;;  %515 = vmatprep.subr.bf16.mxu1 %v539_v1  ;;  %v545_v5 = vld [vmem:[#allocation5 + $0x54] ss:$8 sps:$4 sm:$0xff]   ;;  %v547_v6 = vld [vmem:[#allocation5 + $0x50] ss:$8 sps:$4 sm:$0xff]   ;;  %v548_v7 = vld [vmem:[#allocation5 + $0x44] ss:$8 sps:$4 sm:$0xff]  }
  0x20   :  { %217 = vmatpush1.bf16.msra.mxu0 %v541_v2  ;;  %523 = vmatpush1.bf16.msra.mxu1 %v541_v2  ;;  %v550_v8 = vld [vmem:[#allocation5 + $0x40] ss:$8 sps:$4 sm:$0xff]   ;;  %v551_v9 = vld [vmem:[#allocation5 + $0x34] ss:$8 sps:$4 sm:$0xff]   ;;  %v553_v10 = vld [vmem:[#allocation5 + $0x30] ss:$8 sps:$4 sm:$0xff]  }
  0x21   :  { %218 = vmatprep.subr.bf16.mxu0 %v542_v3  ;;  %516 = vmatprep.subr.bf16.mxu1 %v542_v3  ;;  %v554_v11 = vld [vmem:[#allocation5 + $0x24] ss:$8 sps:$4 sm:$0xff]   ;;  %v556_v12 = vld [vmem:[#allocation5 + $0x20] ss:$8 sps:$4 sm:$0xff]   ;;  %v557_v13 = vld [vmem:[#allocation5 + $0x14] ss:$8 sps:$4 sm:$0xff]  }
  0x22   :  { %v559_v14 = vld [vmem:[#allocation5 + $0x10] ss:$8 sps:$4 sm:$0xff]   ;;  %v560_v15 = vld [vmem:[#allocation5 + $0x4] ss:$8 sps:$4 sm:$0xff]   ;;  %v562_v16 = vld [vmem:[#allocation5] ss:$8 sps:$4 sm:$0xff]  }
  0x23   :  { %v564_v18 = vld [vmem:[#allocation2 + $0x20] sm:$0xff]   ;;  %v565_v19 = vld [vmem:[#allocation2 + $0x8] sm:$0xff]   ;;  %v567_v21 = vld [vmem:[#allocation2 + $0x10] sm:$0xff]   ;;  %v79_v26 = vshrl.u32 %v78_v25, 7 }
  0x24   :  { %219 = vmatpush1.bf16.msra.mxu0 %v544_v4  ;;  %524 = vmatpush1.bf16.msra.mxu1 %v544_v4  ;;  %v566_v20 = vld [vmem:[#allocation2 + $0x28] sm:$0xff]   ;;  %v568_v22 = vld [vmem:[#allocation2 + $0x30] sm:$0xff]   ;;  %v569_v23 = vld [vmem:[#allocation2 + $0x18] sm:$0xff]  }
  0x25   :  { %220 = vmatprep.subr.bf16.mxu0 %v545_v5  ;;  %517 = vmatprep.subr.bf16.mxu1 %v545_v5  ;;  %v570_v24 = vld [vmem:[#allocation2 + $0x38] sm:$0xff]   ;;  %v80_v27 = vsub.s32 0, %v79_v26  ;;  %v84_v28 = vsub.s32 1, %v79_v26  ;;  %v76_v29 = vld [vmem:[%s729_s2] sm:$0x3]  ;;  %s644_s2 = smov [#allocation7]  }
  0x26   :  { %s446_s26 = sshll.u32 %s644_s2, 4  ;;  %s447_s26 = int_to_ptr.vmem [resolvable:$true] %s446_s26 }
  0x27   :  { %v685_v30 = vrot.slane %v76_v29, %v80_v27  ;;  %v687_v31 = vrot.slane %v76_v29, %v84_v28  ;;  %s611_s27 = scalar_lea.vmem %s447_s26, 2048  ;;  %p616_p11 = scmp.lt.s32.totalorder %s447_s26, %s447_s26 }
  0x28   :  { %221 = vmatpush1.bf16.msra.mxu0 %v547_v6  ;;  %525 = vmatpush1.bf16.msra.mxu1 %v547_v6  ;;  %p612_p10 = scmp.ne.s32.totalorder %s447_s26, %s611_s27  ;;  %p617_p12 = scmp.lt.s32.totalorder %s611_s27, %s611_s27 }
  0x29   :  { %222 = vmatprep.subr.bf16.mxu0 %v548_v7  ;;  %518 = vmatprep.subr.bf16.mxu1 %v548_v7 }
  0x2a   :  { %p618_p13 = por %p617_p12, %p616_p11 }
  0x2c   :  { %223 = vmatpush1.bf16.msra.mxu0 %v550_v8  ;;  %526 = vmatpush1.bf16.msra.mxu1 %v550_v8  ;;  %p619_p0 = pnand %p618_p13, %p612_p10 }
  0x2d   :  { %224 = vmatprep.subr.bf16.mxu0 %v551_v9  ;;  %519 = vmatprep.subr.bf16.mxu1 %v551_v9 }
  0x30   :  { %225 = vmatpush1.bf16.msra.mxu0 %v553_v10  ;;  %527 = vmatpush1.bf16.msra.mxu1 %v553_v10 }
  0x31   :  { %226 = vmatprep.subr.bf16.mxu0 %v554_v11  ;;  %520 = vmatprep.subr.bf16.mxu1 %v554_v11 }
  0x34   :  { %227 = vmatpush1.bf16.msra.mxu0 %v556_v12  ;;  %528 = vmatpush1.bf16.msra.mxu1 %v556_v12 }
  0x35   :  { %228 = vmatprep.subr.bf16.mxu0 %v557_v13  ;;  %521 = vmatprep.subr.bf16.mxu1 %v557_v13 }
  0x38   :  { %229 = vmatpush1.bf16.msra.mxu0 %v559_v14  ;;  %529 = vmatpush1.bf16.msra.mxu1 %v559_v14 }
  0x39   :  { %230 = vmatprep.subr.bf16.mxu0 %v560_v15  ;;  %522 = vmatprep.subr.bf16.mxu1 %v560_v15 }
  0x3c   :  { %231 = vmatpush1.bf16.msra.mxu0 %v562_v16  ;;  %530 = vmatpush1.bf16.msra.mxu1 %v562_v16 }
  0x3f   :  { %249 = vmatmul.mubr.bf16.vlgmr.msra.gmra.mxu0 %v563_v17  ;;  %289 = vmatmul.mubr.bf16.vlgmr.msra.gmra.mxu1 %v564_v18 }
  0x40   :  { %258 = vmatprep.mubr.bf16.mxu0 %v643_v0  ;;  %298 = vmatprep.mubr.bf16.mxu1 %v643_v0 }
  0x47   :  { %259 = vmatmul.mubr.bf16.gmra.mxu0 %v565_v19  ;;  %299 = vmatmul.mubr.bf16.gmra.mxu1 %v566_v20 }
  0x48   :  { %268 = vmatprep.mubr.bf16.mxu0 %v643_v0  ;;  %308 = vmatprep.mubr.bf16.mxu1 %v643_v0 }
  0x4f   :  { %269 = vmatmul.mubr.bf16.gmra.mxu0 %v567_v21  ;;  %309 = vmatmul.mubr.bf16.gmra.mxu1 %v568_v22 }
  0x50   :  { %278 = vmatprep.mubr.bf16.mxu0 %v643_v0  ;;  %318 = vmatprep.mubr.bf16.mxu1 %v643_v0 }
  0x57   :  { %279 = vmatmul.mubr.bf16.gmra.mxu0 %v569_v23  ;;  %319 = vmatmul.mubr.bf16.gmra.mxu1 %v570_v24 }
  0xff   :  { %v250_v32 = vpop.f32.mrf.mxu0  ;;  %v290_v33 = vpop.f32.mrf.mxu1 }
 0x100   :  { %v251_v36 = vadd.f32 %v250_v32, %v685_v30  ;;  %v291_v37 = vadd.f32 %v290_v33, %v685_v30 }
 0x101   :  { %v252_v34 = vpop.f32.mrf.mxu0  ;;  %v292_v35 = vpop.f32.mrf.mxu1 }
 0x102   :  { %v253_v38 = vadd.f32 %v252_v34, %v687_v31  ;;  %v293_v39 = vadd.f32 %v292_v35, %v687_v31 }
 0x103   :  { %v254_v40 = vpop.f32.mrf.mxu0  ;;  %v294_v41 = vpop.f32.mrf.mxu1 }
 0x104   :  { %v499_v42 = vpack.c.bf16 %v253_v38, %v251_v36  ;;  %v507_v43 = vpack.c.bf16 %v293_v39, %v291_v37  ;;  %v255_v46 = vadd.f32 %v254_v40, %v685_v30  ;;  %v295_v47 = vadd.f32 %v294_v41, %v685_v30 }
 0x105   :  { %v256_v44 = vpop.f32.mrf.mxu0  ;;  %v296_v45 = vpop.f32.mrf.mxu1 }
 0x106   :  { %425 = vst [vmem:[#allocation7] sm:$0xff] %v499_v42  ;;  %433 = vst [vmem:[#allocation7 + $0x40] sm:$0xff] %v507_v43  ;;  %v257_v48 = vadd.f32 %v256_v44, %v687_v31  ;;  %v297_v49 = vadd.f32 %v296_v45, %v687_v31 }
 0x107   :  { %v260_v50 = vpop.f32.mrf.mxu0  ;;  %v300_v51 = vpop.f32.mrf.mxu1 }
 0x108   :  { %v500_v52 = vpack.c.bf16 %v257_v48, %v255_v46  ;;  %v508_v53 = vpack.c.bf16 %v297_v49, %v295_v47  ;;  %v261_v56 = vadd.f32 %v260_v50, %v685_v30  ;;  %v301_v57 = vadd.f32 %v300_v51, %v685_v30 }
 0x109   :  { %v262_v54 = vpop.f32.mrf.mxu0  ;;  %v302_v55 = vpop.f32.mrf.mxu1 }
 0x10a   :  { %426 = vst [vmem:[#allocation7 + $0x8] sm:$0xff] %v500_v52  ;;  %434 = vst [vmem:[#allocation7 + $0x48] sm:$0xff] %v508_v53  ;;  %v263_v58 = vadd.f32 %v262_v54, %v687_v31  ;;  %v303_v59 = vadd.f32 %v302_v55, %v687_v31 }
 0x10b   :  { %v264_v60 = vpop.f32.mrf.mxu0  ;;  %v304_v61 = vpop.f32.mrf.mxu1 }
 0x10c   :  { %v501_v62 = vpack.c.bf16 %v263_v58, %v261_v56  ;;  %v509_v63 = vpack.c.bf16 %v303_v59, %v301_v57  ;;  %v265_v2 = vadd.f32 %v264_v60, %v685_v30  ;;  %v305_v3 = vadd.f32 %v304_v61, %v685_v30 }
 0x10d   :  { %v266_v0 = vpop.f32.mrf.mxu0  ;;  %v306_v1 = vpop.f32.mrf.mxu1 }
 0x10e   :  { %427 = vst [vmem:[#allocation7 + $0x10] sm:$0xff] %v501_v62  ;;  %435 = vst [vmem:[#allocation7 + $0x50] sm:$0xff] %v509_v63  ;;  %v267_v4 = vadd.f32 %v266_v0, %v687_v31  ;;  %v307_v5 = vadd.f32 %v306_v1, %v687_v31 }
 0x10f   :  { %v270_v6 = vpop.f32.mrf.mxu0  ;;  %v310_v7 = vpop.f32.mrf.mxu1 }
 0x110   :  { %v502_v8 = vpack.c.bf16 %v267_v4, %v265_v2  ;;  %v510_v9 = vpack.c.bf16 %v307_v5, %v305_v3  ;;  %v271_v12 = vadd.f32 %v270_v6, %v685_v30  ;;  %v311_v13 = vadd.f32 %v310_v7, %v685_v30 }
 0x111   :  { %v272_v10 = vpop.f32.mrf.mxu0  ;;  %v312_v11 = vpop.f32.mrf.mxu1 }
 0x112   :  { %428 = vst [vmem:[#allocation7 + $0x18] sm:$0xff] %v502_v8  ;;  %436 = vst [vmem:[#allocation7 + $0x58] sm:$0xff] %v510_v9  ;;  %v273_v14 = vadd.f32 %v272_v10, %v687_v31  ;;  %v313_v15 = vadd.f32 %v312_v11, %v687_v31 }
 0x113   :  { %v274_v16 = vpop.f32.mrf.mxu0  ;;  %v314_v17 = vpop.f32.mrf.mxu1 }
 0x114   :  { %v503_v18 = vpack.c.bf16 %v273_v14, %v271_v12  ;;  %v511_v19 = vpack.c.bf16 %v313_v15, %v311_v13  ;;  %v275_v22 = vadd.f32 %v274_v16, %v685_v30  ;;  %v315_v23 = vadd.f32 %v314_v17, %v685_v30 }
 0x115   :  { %v276_v20 = vpop.f32.mrf.mxu0  ;;  %v316_v21 = vpop.f32.mrf.mxu1 }
 0x116   :  { %429 = vst [vmem:[#allocation7 + $0x20] sm:$0xff] %v503_v18  ;;  %437 = vst [vmem:[#allocation7 + $0x60] sm:$0xff] %v511_v19  ;;  %v277_v24 = vadd.f32 %v276_v20, %v687_v31  ;;  %v317_v25 = vadd.f32 %v316_v21, %v687_v31 }
 0x117   :  { %v280_v26 = vpop.f32.mrf.mxu0  ;;  %v320_v27 = vpop.f32.mrf.mxu1 }
 0x118   :  { %v504_v28 = vpack.c.bf16 %v277_v24, %v275_v22  ;;  %v512_v29 = vpack.c.bf16 %v317_v25, %v315_v23  ;;  %v281_v34 = vadd.f32 %v280_v26, %v685_v30  ;;  %v321_v35 = vadd.f32 %v320_v27, %v685_v30 }
 0x119   :  { %v282_v32 = vpop.f32.mrf.mxu0  ;;  %v322_v33 = vpop.f32.mrf.mxu1 }
 0x11a   :  { %430 = vst [vmem:[#allocation7 + $0x28] sm:$0xff] %v504_v28  ;;  %438 = vst [vmem:[#allocation7 + $0x68] sm:$0xff] %v512_v29  ;;  %v283_v36 = vadd.f32 %v282_v32, %v687_v31  ;;  %v323_v37 = vadd.f32 %v322_v33, %v687_v31 }
 0x11b   :  { %v284_v38 = vpop.f32.mrf.mxu0  ;;  %v324_v39 = vpop.f32.mrf.mxu1 }
 0x11c   :  { %v505_v40 = vpack.c.bf16 %v283_v36, %v281_v34  ;;  %v513_v41 = vpack.c.bf16 %v323_v37, %v321_v35  ;;  %v285_v44 = vadd.f32 %v284_v38, %v685_v30  ;;  %v325_v45 = vadd.f32 %v324_v39, %v685_v30 }
 0x11d   :  { %v286_v42 = vpop.f32.mrf.mxu0  ;;  %v326_v43 = vpop.f32.mrf.mxu1 }
 0x11e   :  { %431 = vst [vmem:[#allocation7 + $0x30] sm:$0xff] %v505_v40  ;;  %439 = vst [vmem:[#allocation7 + $0x70] sm:$0xff] %v513_v41  ;;  %v287_v46 = vadd.f32 %v286_v42, %v687_v31  ;;  %v327_v47 = vadd.f32 %v326_v43, %v687_v31 }
 0x120   :  { %v506_v48 = vpack.c.bf16 %v287_v46, %v285_v44  ;;  %v514_v49 = vpack.c.bf16 %v327_v47, %v325_v45 }
 0x122   :  { %432 = vst [vmem:[#allocation7 + $0x38] sm:$0xff] %v506_v48  ;;  %440 = vst [vmem:[#allocation7 + $0x78] sm:$0xff] %v514_v49 }
 0x123   :  { %622 = shalt.err (!%p619_p0)
}
 0x124   :  { %452 = dma.vmem_to_hbm [thread:$0]  %s447_s26, 2048, %s730_s3, [#allocation4], %s641_s22, %s641_s22, %s642_s23  }
 0x125   :  { %635 = dma.done.wait [#allocation4], 2048  }
 0x126   :  { %636 = vsyncadd [#allocation4], 4294965248 }
 0x127   :  { %456 = vsyncpa [#allocation3], 1 }
 0x128   :  { %457 = vsyncpa [#allocation6], 1 }
 0x129   :  { %458 = vsyncpa [#allocation4], 1 }

</bundles_post_ra>
